<compile_context>
chip_gen: v6e
topology: v6e:2x2x1
jax: 0.10.0
libtpu: 0.0.40
codegen_flags: <defaults>
</compile_context>

<pallas_src>
import functools

import jax
import jax.numpy as jnp
from jax.experimental import pallas as pl
from jax.experimental.pallas import tpu as pltpu

_LANE = 128      # lane width of a vreg (last-dim tiling quantum)
_SUBLANE = 8     # sublane count (second-to-last-dim tiling quantum)


def _round_up(v, m):
    return (v + m - 1) // m * m


def _sigmoid_feature_norm_kernel(x_ref, p_ref, o_ref, *, n_valid):
    """Grid-less body. x_ref:(1,n_pad)  p_ref:(h_pad,slab_cols)  o_ref:(1,n_pad).

    Layout: batch N on the lane axis, hidden H on sublanes -> the input DMA,
    the fc2 matmul operands and the output store are all lane-dense.
    """
    h_pad = p_ref.shape[0]
    n_pad = x_ref.shape[1]

    x = x_ref[...]                                        # (1, n_pad)

    # Validity mask for padded lanes (columns >= n_valid). Padded lanes carry
    # finite garbage down the layers; they must not pollute the *global*
    # Frobenius norms, so every norm reduces over (v * mask).
    lane_idx = jax.lax.broadcasted_iota(jnp.int32, (1, n_pad), 1)
    mask = (lane_idx < n_valid).astype(jnp.float32)       # (1, n_pad)

    # Static (zero-cost) column slices of the packed parameter slab.
    w2 = p_ref[:, 0:h_pad]                  # (h_pad, h_pad) fc2.weight (out, in)
    w1 = p_ref[:, h_pad + 0:h_pad + 1]      # (h_pad, 1)     fc1.weight
    b1 = p_ref[:, h_pad + 1:h_pad + 2]      # (h_pad, 1)     fc1.bias
    b2 = p_ref[:, h_pad + 2:h_pad + 3]      # (h_pad, 1)     fc2.bias
    w3 = p_ref[:, h_pad + 3:h_pad + 4]      # (h_pad, 1)     fc3.weight (column)
    b3 = p_ref[0:1, h_pad + 4:h_pad + 5]    # (1, 1)         fc3.bias

    def _sigmoid(v):
        # sigmoid(v) == 0.5 * tanh(0.5 * v) + 0.5  -> one EUP tanh
        return 0.5 * jnp.tanh(0.5 * v) + 0.5

    def _fnorm(v):
        # v / ||v||_F with padded lanes excluded from the norm; EUP rsqrt.
        vm = v * mask
        return v * jax.lax.rsqrt(jnp.sum(vm * vm))

    # fc1: Linear(1 -> H)  == column-broadcast multiply + bias.
    h1 = _fnorm(w1 * x + b1)                                            # (h_pad, n_pad)

    # fc2: Sigmoid -> Linear(H -> H).  f32 MXU matmul (tiny at H=32; stays f32).
    h2 = _fnorm(jnp.dot(w2, _sigmoid(h1),
                        preferred_element_type=jnp.float32) + b2)       # (h_pad, n_pad)

    # fc3: Sigmoid -> Linear(H -> 1)  == sublane reduction (XLU).
    # TODO(synk): if a bundle dump ever shows the XLU slot saturated, also pack
    # w3 as a (1, H) row and use jnp.dot to move this reduce onto the idle MXU.
    h3 = _fnorm(jnp.sum(w3 * _sigmoid(h2), axis=0, keepdims=True) + b3)  # (1, n_pad)

    o_ref[...] = _sigmoid(h3)                       # lane-dense (1, n_pad) store


def pack_params(w1, b1, w2, b2, w3, b3):
    """One-time packing of all parameters into a single (h_pad, >=128) f32 slab.

    Columns [0:h_pad] = W2 (zero-padded), then w1, b1, b2, w3^T, b3 columns,
    then zero padding out to a multiple of 128 lanes so every DMA'd row is a
    full lane-aligned line.  Zero padding is semantics-preserving: padded
    rows/columns produce exactly-zero activations and zero contributions to
    every matmul and norm.

    Call this ONCE (outside the hot loop) and reuse the slab; the concat/pad
    here is an HBM copy that must not sit on the per-call path.
    """
    hidden = w2.shape[0]
    h_pad = _round_up(max(hidden, _SUBLANE), _SUBLANE)
    f32 = jnp.float32

    def col(v):
        v = jnp.reshape(v, (-1, 1)).astype(f32)
        return jnp.pad(v, ((0, h_pad - v.shape[0]), (0, 0)))

    w2p = jnp.pad(w2.astype(f32), ((0, h_pad - hidden), (0, h_pad - hidden)))
    b3c = jnp.broadcast_to(jnp.reshape(b3, (1, 1)).astype(f32), (h_pad, 1))

    slab = jnp.concatenate(
        [w2p, col(w1), col(b1), col(b2), col(jnp.reshape(w3, (-1,))), b3c],
        axis=1)
    slab_cols = _round_up(slab.shape[1], _LANE)
    slab = jnp.pad(slab, ((0, 0), (0, slab_cols - slab.shape[1])))
    # TODO(synk): for large H (>~ a few hundred) pass W2 as its own input and
    # pack only the five small vectors into an (h_pad, 8) slab (3 DMAs total).
    return slab


def sigmoid_feature_norm_packed(x, slab):
    """Hot path.  x: (N, 1), slab from pack_params.  Returns (N, 1) f32."""
    n = x.shape[0]
    h_pad, slab_cols = slab.shape
    n_pad = _round_up(max(n, _LANE), _LANE)

    # Batch on the lane axis, zero-padded to a 128-lane multiple so the input
    # DMA and the (1, n_pad) output store are unmasked and lane-dense.
    x_lane = jnp.pad(jnp.reshape(x, (1, n)).astype(jnp.float32),
                     ((0, 0), (0, n_pad - n)))

    # VMEM budget: slab tile + padded x/out tiles + ~6 live (h_pad, n_pad)
    # f32 intermediates.  Keep comfortably inside v7x's 64 MiB physical VMEM.
    est = 4 * (h_pad * slab_cols + 2 * _SUBLANE * n_pad + 8 * h_pad * n_pad)
    vmem_limit = int(min(max(est + (2 << 20), 16 << 20), 48 << 20))
    # TODO(synk): for very large N (v7x: ~>100K samples at H=32) switch to an
    # N-tiled two-pass kernel (per-tile sum-of-squares accumulated in SMEM,
    # normalize on a second pass) instead of raising vmem_limit further.

    vmem_spec = pl.BlockSpec(memory_space=pltpu.MemorySpace.VMEM)
    out = pl.pallas_call(
        functools.partial(_sigmoid_feature_norm_kernel, n_valid=n),
        out_shape=jax.ShapeDtypeStruct((1, n_pad), jnp.float32),
        in_specs=[vmem_spec, vmem_spec],
        out_specs=vmem_spec,
        compiler_params=pltpu.CompilerParams(vmem_limit_bytes=vmem_limit),
    )(x_lane, slab)

    # TODO(synk): many independent instances should share ONE pallas_call with
    # a leading grid axis marked dimension_semantics=("parallel",) to amortize
    # launch cost and let v7x's two TensorCores split the batch; a single
    # instance cannot be split (the global norms couple all rows).

    # Keep the lane-dense (1, n_pad) kernel layout; slicing + the (1,N)->(N,1)
    # reshape is a metadata-only bitcast (same linear order).  Callers that
    # accept a flat (N,) vector can take out[0, :n] directly.
    return jnp.reshape(out[:, :n], (n, 1))


def sigmoid_feature_norm(x, w1, b1, w2, b2, w3, b3):
    """Convenience wrapper (packs every call).  Prefer pack_params + packed."""
    return sigmoid_feature_norm_packed(x, pack_params(w1, b1, w2, b2, w3, b3))


def _reference(x, w1, b1, w2, b2, w3, b3):
    h1 = x @ w1.T + b1
    h1 = h1 / jnp.linalg.norm(h1)
    h2 = jax.nn.sigmoid(h1) @ w2.T + b2
    h2 = h2 / jnp.linalg.norm(h2)
    h3 = jax.nn.sigmoid(h2) @ w3.T + b3
    h3 = h3 / jnp.linalg.norm(h3)
    return jax.nn.sigmoid(h3)


if __name__ == "__main__":
    hidden = 32   # hidden_neuron
    n = 8         # batch of scalar samples, input shape (N, 1)

    key = jax.random.PRNGKey(0)
    kx, k1, k2, k3, kb1, kb2, kb3 = jax.random.split(key, 7)

    x = jax.random.normal(kx, (n, 1), dtype=jnp.float32)

    # PyTorch-style Linear init: U(-1/sqrt(fan_in), 1/sqrt(fan_in)),
    # weights in PyTorch layout (out_features, in_features), bias (out_features,).
    def lin_init(kw, kb, fan_in, fan_out):
        bound = float(fan_in) ** -0.5
        w = jax.random.uniform(kw, (fan_out, fan_in), jnp.float32, -bound, bound)
        b = jax.random.uniform(kb, (fan_out,), jnp.float32, -bound, bound)
        return w, b

    w1, b1 = lin_init(k1, kb1, 1, hidden)        # fc1: Linear(1 -> H)
    w2, b2 = lin_init(k2, kb2, hidden, hidden)   # fc2: Linear(H -> H)
    w3, b3 = lin_init(k3, kb3, hidden, 1)        # fc3: Linear(H -> 1)

    # One-time parameter packing (hoisted off the per-call hot path).
    slab = jax.block_until_ready(pack_params(w1, b1, w2, b2, w3, b3))

    fwd = jax.jit(sigmoid_feature_norm_packed)
    out = jax.block_until_ready(fwd(x, slab))

    ref = _reference(x, w1, b1, w2, b2, w3, b3)
    assert out.shape == (n, 1)
    assert jnp.allclose(out, ref, atol=1e-5, rtol=1e-5)

    print("KERNEL_OK")
</pallas_src>

<mosaic_0001>
module attributes {stable_mosaic.version = 11 : i64} {
  func.func @_sigmoid_feature_norm_kernel(%arg0: memref<1x128xf32, #tpu.memory_space<vmem>>, %arg1: memref<32x128xf32, #tpu.memory_space<vmem>>, %arg2: memref<1x128xf32, #tpu.memory_space<vmem>>) attributes {dimension_semantics = [], scalar_prefetch = 0 : i64, scratch_operands = 0 : i64, tpu.core_type = #tpu.core_type<tc>} {
    %c0 = arith.constant 0 : index
    %c0_0 = arith.constant 0 : index
    %0 = vector.load %arg0[%c0, %c0_0] : memref<1x128xf32, #tpu.memory_space<vmem>>, vector<1x128xf32>
    %1 = tpu.iota {dimensions = array<i32: 1>} : vector<1x128xi32>
    %c8_i32 = arith.constant 8 : i32
    %2 = vector.broadcast %c8_i32 : i32 to vector<1x128xi32>
    %3 = arith.cmpi slt, %1, %2 : vector<1x128xi32>
    %4 = arith.extui %3 : vector<1x128xi1> to vector<1x128xi32>
    %5 = arith.sitofp %4 : vector<1x128xi32> to vector<1x128xf32>
    %c0_1 = arith.constant 0 : index
    %c0_2 = arith.constant 0 : index
    %6 = vector.load %arg1[%c0_1, %c0_2] : memref<32x128xf32, #tpu.memory_space<vmem>>, vector<32x32xf32>
    %c0_3 = arith.constant 0 : index
    %c32 = arith.constant 32 : index
    %7 = vector.load %arg1[%c0_3, %c32] : memref<32x128xf32, #tpu.memory_space<vmem>>, vector<32x1xf32>
    %c0_4 = arith.constant 0 : index
    %c33 = arith.constant 33 : index
    %8 = vector.load %arg1[%c0_4, %c33] : memref<32x128xf32, #tpu.memory_space<vmem>>, vector<32x1xf32>
    %c0_5 = arith.constant 0 : index
    %c34 = arith.constant 34 : index
    %9 = vector.load %arg1[%c0_5, %c34] : memref<32x128xf32, #tpu.memory_space<vmem>>, vector<32x1xf32>
    %c0_6 = arith.constant 0 : index
    %c35 = arith.constant 35 : index
    %10 = vector.load %arg1[%c0_6, %c35] : memref<32x128xf32, #tpu.memory_space<vmem>>, vector<32x1xf32>
    %c0_7 = arith.constant 0 : index
    %c36 = arith.constant 36 : index
    %11 = vector.load %arg1[%c0_7, %c36] : memref<32x128xf32, #tpu.memory_space<vmem>>, vector<1x1xf32>
    %12 = vector.broadcast %7 : vector<32x1xf32> to vector<32x128xf32>
    %13 = vector.broadcast %0 : vector<1x128xf32> to vector<32x128xf32>
    %14 = arith.mulf %12, %13 : vector<32x128xf32>
    %15 = vector.broadcast %8 : vector<32x1xf32> to vector<32x128xf32>
    %16 = arith.addf %14, %15 : vector<32x128xf32>
    %17 = vector.broadcast %5 : vector<1x128xf32> to vector<32x128xf32>
    %18 = arith.mulf %16, %17 : vector<32x128xf32>
    %19 = arith.mulf %18, %18 : vector<32x128xf32>
    %20 = vector.shape_cast %19 : vector<32x128xf32> to vector<1x32x128xf32>
    %cst = arith.constant dense<0.000000e+00> : vector<1xf32>
    %21 = vector.multi_reduction <add>, %20, %cst [1, 2] : vector<1x32x128xf32> to vector<1xf32>
    %22 = vector.shape_cast %21 : vector<1xf32> to vector<1x1x1xf32>
    %23 = vector.extract %22[0, 0, 0] : f32 from vector<1x1x1xf32>
    %24 = math.rsqrt %23 : f32
    %25 = vector.broadcast %24 : f32 to vector<32x128xf32>
    %26 = arith.mulf %16, %25 : vector<32x128xf32>
    %cst_8 = arith.constant 5.000000e-01 : f32
    %27 = vector.broadcast %cst_8 : f32 to vector<32x128xf32>
    %28 = arith.mulf %27, %26 : vector<32x128xf32>
    %29 = math.tanh %28 : vector<32x128xf32>
    %cst_9 = arith.constant 5.000000e-01 : f32
    %30 = vector.broadcast %cst_9 : f32 to vector<32x128xf32>
    %31 = arith.mulf %30, %29 : vector<32x128xf32>
    %cst_10 = arith.constant 5.000000e-01 : f32
    %32 = vector.broadcast %cst_10 : f32 to vector<32x128xf32>
    %33 = arith.addf %31, %32 : vector<32x128xf32>
    %cst_11 = arith.constant dense<0.000000e+00> : vector<32x128xf32>
    %34 = tpu.matmul %6, %33, %cst_11 {dimension_numbers = #tpu.dot_dimension_numbers<[1], [0], [0], [1], [0, 0, 1, 1], [], []>} : vector<32x32xf32>, vector<32x128xf32>, vector<32x128xf32> -> vector<32x128xf32>
    %35 = vector.broadcast %9 : vector<32x1xf32> to vector<32x128xf32>
    %36 = arith.addf %34, %35 : vector<32x128xf32>
    %37 = vector.broadcast %5 : vector<1x128xf32> to vector<32x128xf32>
    %38 = arith.mulf %36, %37 : vector<32x128xf32>
    %39 = arith.mulf %38, %38 : vector<32x128xf32>
    %40 = vector.shape_cast %39 : vector<32x128xf32> to vector<1x32x128xf32>
    %cst_12 = arith.constant dense<0.000000e+00> : vector<1xf32>
    %41 = vector.multi_reduction <add>, %40, %cst_12 [1, 2] : vector<1x32x128xf32> to vector<1xf32>
    %42 = vector.shape_cast %41 : vector<1xf32> to vector<1x1x1xf32>
    %43 = vector.extract %42[0, 0, 0] : f32 from vector<1x1x1xf32>
    %44 = math.rsqrt %43 : f32
    %45 = vector.broadcast %44 : f32 to vector<32x128xf32>
    %46 = arith.mulf %36, %45 : vector<32x128xf32>
    %cst_13 = arith.constant 5.000000e-01 : f32
    %47 = vector.broadcast %cst_13 : f32 to vector<32x128xf32>
    %48 = arith.mulf %47, %46 : vector<32x128xf32>
    %49 = math.tanh %48 : vector<32x128xf32>
    %cst_14 = arith.constant 5.000000e-01 : f32
    %50 = vector.broadcast %cst_14 : f32 to vector<32x128xf32>
    %51 = arith.mulf %50, %49 : vector<32x128xf32>
    %cst_15 = arith.constant 5.000000e-01 : f32
    %52 = vector.broadcast %cst_15 : f32 to vector<32x128xf32>
    %53 = arith.addf %51, %52 : vector<32x128xf32>
    %54 = vector.broadcast %10 : vector<32x1xf32> to vector<32x128xf32>
    %55 = arith.mulf %54, %53 : vector<32x128xf32>
    %cst_16 = arith.constant dense<0.000000e+00> : vector<128xf32>
    %56 = vector.multi_reduction <add>, %55, %cst_16 [0] : vector<32x128xf32> to vector<128xf32>
    %57 = vector.shape_cast %56 : vector<128xf32> to vector<1x128xf32>
    %58 = vector.broadcast %11 : vector<1x1xf32> to vector<1x128xf32>
    %59 = arith.addf %57, %58 : vector<1x128xf32>
    %60 = arith.mulf %59, %5 : vector<1x128xf32>
    %61 = arith.mulf %60, %60 : vector<1x128xf32>
    %62 = vector.shape_cast %61 : vector<1x128xf32> to vector<1x1x128xf32>
    %cst_17 = arith.constant dense<0.000000e+00> : vector<1xf32>
    %63 = vector.multi_reduction <add>, %62, %cst_17 [1, 2] : vector<1x1x128xf32> to vector<1xf32>
    %64 = vector.shape_cast %63 : vector<1xf32> to vector<1x1x1xf32>
    %65 = vector.extract %64[0, 0, 0] : f32 from vector<1x1x1xf32>
    %66 = math.rsqrt %65 : f32
    %67 = vector.broadcast %66 : f32 to vector<1x128xf32>
    %68 = arith.mulf %59, %67 : vector<1x128xf32>
    %cst_18 = arith.constant 5.000000e-01 : f32
    %69 = vector.broadcast %cst_18 : f32 to vector<1x128xf32>
    %70 = arith.mulf %69, %68 : vector<1x128xf32>
    %71 = math.tanh %70 : vector<1x128xf32>
    %cst_19 = arith.constant 5.000000e-01 : f32
    %72 = vector.broadcast %cst_19 : f32 to vector<1x128xf32>
    %73 = arith.mulf %72, %71 : vector<1x128xf32>
    %cst_20 = arith.constant 5.000000e-01 : f32
    %74 = vector.broadcast %cst_20 : f32 to vector<1x128xf32>
    %75 = arith.addf %73, %74 : vector<1x128xf32>
    %c0_21 = arith.constant 0 : index
    %c0_22 = arith.constant 0 : index
    %76 = vector.load %arg2[%c0_21, %c0_22] : memref<1x128xf32, #tpu.memory_space<vmem>>, vector<1x128xf32>
    tpu.vector_store %arg2[%c0_21, %c0_22], %75 {strides = array<i32>} : memref<1x128xf32, #tpu.memory_space<vmem>>, vector<1x128xf32>,
    return
  }
}

</mosaic_0001>

<bundles_post_ra>
// kernel: sigmoid_feature_norm_packed.1
= control target key start
LH: loop header
LB: loop body
LE: loop exit
PB: predicated region body
PF: predicated region fallthrough
CT: control target
= control target key end

     0   :  { %7 = vsyncpa [#allocation3], 0  ;;  %s461_s9 = smov [#allocation2]   ;;  %s537_s0 = inlined_call_operand.vmem [shape: f32[1,128], index: 0, kind: input, shape index: {}]   ;;  %s538_s1 = inlined_call_operand.hbm [shape: f32[32,128], index: 1, kind: input, shape index: {}]   ;;  %s539_s2 = inlined_call_operand.vmem [shape: f32[1,128], index: 2, kind: output, shape index: {}]  }
   0x1   :  { %s15_s10 = sshll.u32 %s461_s9, 4  ;;  %s16_s10 = int_to_ptr.vmem [resolvable:$true] %s15_s10 }
   0x2   :  { %s447_s11 = scalar_lea.vmem %s16_s10, 512  ;;  %p452_p1 = scmp.lt.s32.totalorder %s16_s10, %s16_s10 }
   0x3   :  { %p448_p0 = scmp.ne.s32.totalorder %s16_s10, %s447_s11  ;;  %p453_p2 = scmp.lt.s32.totalorder %s447_s11, %s447_s11 }
   0x5   :  { %p454_p3 = por %p453_p2, %p452_p1 }
   0x7   :  { %p455_p4 = pnand %p454_p3, %p448_p0 }
   0x9   :  { %458 = shalt.err (!%p455_p4)
}
   0xa   :  { %s462_s12 = smov 128   ;;  %s463_s13 = smov 8  }
   0xb   :  { %21 = dma.hbm_to_vmem [thread:$0]  %s538_s1, 512, %s16_s10, [#allocation3], %s462_s12, %s462_s12, %s463_s13  }
   0xc   :  { %459 = dma.done.wait [#allocation3], 512  }
   0xd   :  { %460 = vsyncadd [#allocation3], 4294966784  ;;  %v464_v0 = vmov 32   ;;  %v488_v1 = vld [vmem:[#allocation2 + $0x10] sm:$0xff]  ;;  %v490_v2 = vld [vmem:[#allocation2] sm:$0xff]  ;;  %v465_v4 = vmov 33   ;;  %v26_v8 = vlaneseq }
   0xe   :  { %405 = vset.pattern.permute.xlu1 %v464_v0  ;;  %404 = vset.pattern.permute.xlu0 %v464_v0  ;;  %v494_v3 = vld [vmem:[#allocation2 + $0x8] sm:$0xff]  ;;  %v498_v5 = vld [vmem:[#allocation2 + $0x18] sm:$0xff]  ;;  %v348_v11 = vld [vmem:[%s537_s0] ss:$0 sm:$0xff]  ;;  %v466_v19 = vmov 0.0   ;;  %vm146_vm1 = vcmask 261120  }
   0xf   :  { %48 = vperm.xlu1 %405, %v488_v1   ;;  %38 = vperm.xlu0 %404, %v490_v2   ;;  %v27_v10 = vand.u32 127, %v26_v8  ;;  %v467_v45 = vmov 34   ;;  %vm321_vm2 = vcmask 1040384  }
  0x10   :  { %369 = vmatprep.mubr.msk.f32.mxu0 %vm146_vm1, %v490_v2  ;;  %372 = vmatprep.mubr.msk.f32.mxu1 %vm146_vm1, %v488_v1 }
  0x11   :  { %vm28_vm0 = vcmp.lt.s32.totalorder %v27_v10, 8 }
  0x12   :  { %v507_v20 = vsel %vm28_vm0, 1.0, %v466_v19 }
  0x13   :  { %406 = vset.pattern.permute.xlu1 %v465_v4  ;;  %43 = vperm.xlu0 %404, %v494_v3  }
  0x14   :  { %67 = vperm.xlu1 %406, %v490_v2  }
  0x17   :  { %407 = vset.pattern.permute.xlu0 %v465_v4 }
  0x18   :  { %408 = vset.pattern.permute.xlu1 %v464_v0  ;;  %71 = vperm.xlu0 %407, %v494_v3  }
  0x19   :  { %53 = vperm.xlu1 %408, %v498_v5  }
  0x1c   :  { %79 = vperm.xlu0 %407, %v498_v5  }
  0x1d   :  { %409 = vset.pattern.permute.xlu1 %v465_v4 }
  0x1e   :  { %75 = vperm.xlu1 %409, %v488_v1  }
  0x20   :  { %410 = vset.pattern.permute.xlu0 %v467_v45 }
  0x21   :  { %131 = vperm.xlu0 %410, %v490_v2  }
  0x25   :  { %135 = vperm.xlu0 %410, %v494_v3  }
  0x29   :  { %139 = vperm.xlu0 %410, %v488_v1  }
  0x2d   :  { %143 = vperm.xlu0 %410, %v498_v5  }
  0x8a   :  { %v49_v6 = vpop.permute.xlu1 %48  ;;  %v39_v7 = vpop.permute.xlu0 %38 }
  0x8b   :  { %v62_v13 = vmul.f32 %v348_v11, %v39_v7  ;;  %v64_v24 = vmul.f32 %v348_v11, %v49_v6 }
  0x8e   :  { %v44_v9 = vpop.permute.xlu0 %43 }
  0x8f   :  { %v68_v12 = vpop.permute.xlu1 %67  ;;  %v63_v14 = vmul.f32 %v348_v11, %v44_v9 }
  0x90   :  { %v82_v16 = vadd.f32 %v68_v12, %v62_v13 }
  0x92   :  { %v86_v25 = vmul.f32 %v507_v20, %v82_v16 }
  0x93   :  { %v72_v15 = vpop.permute.xlu0 %71 }
  0x94   :  { %v83_v17 = vadd.f32 %v72_v15, %v63_v14  ;;  %v54_v18 = vpop.permute.xlu1 %53  ;;  %v90_v30 = vmul.f32 %v86_v25, %v86_v25 }
  0x95   :  { %v65_v21 = vmul.f32 %v348_v11, %v54_v18 }
  0x96   :  { %v87_v22 = vmul.f32 %v507_v20, %v83_v17 }
  0x97   :  { %v80_v23 = vpop.permute.xlu0 %79 }
  0x98   :  { %v85_v26 = vadd.f32 %v80_v23, %v65_v21  ;;  %v91_v28 = vmul.f32 %v87_v22, %v87_v22 }
  0x99   :  { %v76_v27 = vpop.permute.xlu1 %75 }
  0x9a   :  { %v84_v29 = vadd.f32 %v76_v27, %v64_v24  ;;  %v89_v31 = vmul.f32 %v507_v20, %v85_v26  ;;  %v94_v33 = vadd.f32 %v91_v28, %v90_v30 }
  0x9c   :  { %v88_v32 = vmul.f32 %v507_v20, %v84_v29  ;;  %v93_v35 = vmul.f32 %v89_v31, %v89_v31  ;;  %v132_v9 = vpop.permute.xlu0 %131 }
  0x9e   :  { %v92_v34 = vmul.f32 %v88_v32, %v88_v32 }
  0xa0   :  { %v95_v36 = vadd.f32 %v94_v33, %v92_v34  ;;  %v136_v10 = vpop.permute.xlu0 %135  ;;  %v468_v33 = vmov 35   ;;  %v469_v34 = vmov 36  }
  0xa1   :  { %411 = vset.pattern.permute.xlu1 %v468_v33  ;;  %412 = vset.pattern.permute.xlu0 %v468_v33 }
  0xa2   :  { %v96_v37 = vadd.f32 %v95_v36, %v93_v35  ;;  %v35_v35 = vld [vmem:[#allocation2] sm:$0x1] }
  0xa4   :  { %97 = vadd.xlane.f32.xlu1 %v96_v37  ;;  %v140_v11 = vpop.permute.xlu0 %139 }
  0xa8   :  { %v144_v14 = vpop.permute.xlu0 %143 }
  0xb5   :  { %285 = vperm.xlu1 %411, %v490_v2  }
  0xb9   :  { %289 = vperm.xlu1 %411, %v494_v3  }
  0xbd   :  { %297 = vperm.xlu1 %411, %v498_v5  }
  0xc1   :  { %413 = vset.pattern.permute.xlu1 %v469_v34 }
  0xc2   :  { %315 = vperm.xlu1 %413, %v35_v35  }
 0x12d   :  { %v98_v38 = vpop.xlane.xlu1 %97 }
 0x12e   :  { %v99_v39 = vrot.slane %v98_v38, 4 }
 0x130   :  { %v100_v40 = vadd.f32 %v99_v39, %v98_v38 }
 0x132   :  { %v101_v41 = vrot.slane %v100_v40, 2 }
 0x134   :  { %v102_v42 = vadd.f32 %v101_v41, %v100_v40 }
 0x136   :  { %v103_v43 = vrot.slane %v102_v42, 1 }
 0x138   :  { %v104_v44 = vadd.f32 %v103_v43, %v102_v42 }
 0x13a   :  { %383 = vpush %v104_v44 }
 0x16b   :  { %s384_s0 = spop %383 }
 0x16c   :  { %v106_v46 = vstv %s384_s0 }
 0x16d   :  { %415 = vrsqrt.f32 %v106_v46 }
 0x17a   :  { %v416_v47 = vpop.eup %415 }
 0x17b   :  { %385 = vpush %v416_v47 }
 0x1ac   :  { %s386_s17 = spop %385 }
 0x1ad   :  { %v109_v48 = vstv %s386_s17 }
 0x1ae   :  { %v111_v49 = vmul.f32 %v109_v48, %v83_v17  ;;  %v112_v50 = vmul.f32 %v109_v48, %v84_v29  ;;  %v113_v51 = vmul.f32 %v109_v48, %v85_v26  ;;  %v110_v52 = vmul.f32 %v109_v48, %v82_v16 }
 0x1b0   :  { %v115_v53 = vmul.f32 0.5, %v111_v49  ;;  %v116_v54 = vmul.f32 0.5, %v112_v50  ;;  %v117_v55 = vmul.f32 0.5, %v113_v51  ;;  %v114_v56 = vmul.f32 0.5, %v110_v52  ;;  %v286_v50 = vpop.permute.xlu1 %285 }
 0x1b2   :  { %417 = vtanh.f32 %v115_v53 }
 0x1b3   :  { %419 = vtanh.f32 %v116_v54 }
 0x1b4   :  { %421 = vtanh.f32 %v117_v55 }
 0x1b5   :  { %423 = vtanh.f32 %v114_v56 }
 0x1bf   :  { %v418_v57 = vpop.eup %417 }
 0x1c0   :  { %v420_v58 = vpop.eup %419  ;;  %v123_v0 = vmul.f32 0.5, %v418_v57 }
 0x1c1   :  { %v422_v59 = vpop.eup %421  ;;  %v124_v61 = vmul.f32 0.5, %v420_v58  ;;  %v290_v58 = vpop.permute.xlu1 %289 }
 0x1c2   :  { %v125_v60 = vmul.f32 0.5, %v422_v59  ;;  %v424_v62 = vpop.eup %423  ;;  %v127_v7 = vadd.f32 0.5, %v123_v0 }
 0x1c3   :  { %v128_v4 = vadd.f32 0.5, %v124_v61  ;;  %v122_v6 = vmul.f32 0.5, %v424_v62 }
 0x1c4   :  { %v129_v63 = vadd.f32 0.5, %v125_v60 }
 0x1c5   :  { %v126_v8 = vadd.f32 0.5, %v122_v6 }
 0x1c6   :  { %361 = vmatprep.subr.mxu0 %v129_v63  ;;  %375 = vmatprep.subr.mxu1 %v129_v63 }
 0x1c7   :  { %362 = vmatpush3.msra.mxu0 %v129_v63  ;;  %379 = vmatpush3.msra.mxu1 %v129_v63 }
 0x1c8   :  { %363 = vmatprep.subr.mxu0 %v128_v4  ;;  %376 = vmatprep.subr.mxu1 %v128_v4 }
 0x1c9   :  { %364 = vmatpush3.msra.mxu0 %v128_v4  ;;  %380 = vmatpush3.msra.mxu1 %v128_v4 }
 0x1ca   :  { %365 = vmatprep.subr.mxu0 %v127_v7  ;;  %377 = vmatprep.subr.mxu1 %v127_v7 }
 0x1cb   :  { %366 = vmatpush3.msra.mxu0 %v127_v7  ;;  %381 = vmatpush3.msra.mxu1 %v127_v7 }
 0x1cc   :  { %367 = vmatprep.subr.mxu0 %v126_v8  ;;  %378 = vmatprep.subr.mxu1 %v126_v8 }
 0x1cd   :  { %368 = vmatpush3.msra.mxu0 %v126_v8  ;;  %382 = vmatpush3.msra.mxu1 %v126_v8 }
 0x1ce   :  { %370 = vmatmul.mubr.msk.f32.vlgmr.msra.gmra.mxu0 %vm146_vm1, %v494_v3  ;;  %373 = vmatmul.mubr.msk.f32.vlgmr.msra.gmra.mxu1 %vm146_vm1, %v498_v5 }
 0x28e   :  { %v371_v12 = vpop.f32.mrf.mxu0  ;;  %v374_v13 = vpop.f32.mrf.mxu1 }
 0x28f   :  { %v227_v15 = vadd.f32 %v371_v12, %v136_v10  ;;  %v237_v19 = vadd.f32 %v374_v13, %v144_v14 }
 0x290   :  { %v221_v16 = vpop.f32.mrf.mxu0  ;;  %v231_v17 = vpop.f32.mrf.mxu1 }
 0x291   :  { %v241_v18 = vmul.f32 %v507_v20, %v227_v15  ;;  %v222_v21 = vadd.f32 %v221_v16, %v132_v9  ;;  %v232_v22 = vadd.f32 %v231_v17, %v140_v11  ;;  %v243_v26 = vmul.f32 %v507_v20, %v237_v19  ;;  %v298_v9 = vpop.permute.xlu1 %297 }
 0x293   :  { %v240_v23 = vmul.f32 %v507_v20, %v222_v21  ;;  %v242_v24 = vmul.f32 %v507_v20, %v232_v22  ;;  %v245_v25 = vmul.f32 %v241_v18, %v241_v18  ;;  %v247_v30 = vmul.f32 %v243_v26, %v243_v26 }
 0x295   :  { %v244_v27 = vmul.f32 %v240_v23, %v240_v23  ;;  %v246_v29 = vmul.f32 %v242_v24, %v242_v24  ;;  %v316_v18 = vpop.permute.xlu1 %315 }
 0x297   :  { %v248_v28 = vadd.f32 %v245_v25, %v244_v27 }
 0x299   :  { %v249_v31 = vadd.f32 %v248_v28, %v246_v29 }
 0x29b   :  { %v250_v32 = vadd.f32 %v249_v31, %v247_v30 }
 0x29d   :  { %251 = vadd.xlane.f32.xlu0 %v250_v32 }
 0x2b3   :  { %293 = vperm.xlu0 %412, %v488_v1  }
 0x2b7   :  { %414 = vset.pattern.permute.xlu0 %v469_v34 }
 0x326   :  { %v252_v36 = vpop.xlane.xlu0 %251 }
 0x327   :  { %v253_v37 = vrot.slane %v252_v36, 4 }
 0x329   :  { %v254_v38 = vadd.f32 %v253_v37, %v252_v36 }
 0x32b   :  { %v255_v39 = vrot.slane %v254_v38, 2 }
 0x32d   :  { %v256_v40 = vadd.f32 %v255_v39, %v254_v38 }
 0x32e   :  { %v294_v0 = vpop.permute.xlu0 %293 }
 0x32f   :  { %v257_v41 = vrot.slane %v256_v40, 1 }
 0x331   :  { %v258_v42 = vadd.f32 %v257_v41, %v256_v40 }
 0x333   :  { %387 = vpush %v258_v42 }
 0x364   :  { %s388_s18 = spop %387 }
 0x365   :  { %v260_v2 = vstv %s388_s18 }
 0x366   :  { %425 = vrsqrt.f32 %v260_v2 }
 0x373   :  { %v426_v1 = vpop.eup %425 }
 0x374   :  { %389 = vpush %v426_v1 }
 0x3a5   :  { %s390_s19 = spop %389 }
 0x3a6   :  { %v263_v3 = vstv %s390_s19 }
 0x3a7   :  { %v264_v43 = vmul.f32 %v263_v3, %v222_v21  ;;  %v265_v5 = vmul.f32 %v263_v3, %v227_v15  ;;  %v266_v44 = vmul.f32 %v263_v3, %v232_v22  ;;  %v267_v45 = vmul.f32 %v263_v3, %v237_v19 }
 0x3a9   :  { %v268_v46 = vmul.f32 0.5, %v264_v43  ;;  %v269_v47 = vmul.f32 0.5, %v265_v5  ;;  %v270_v48 = vmul.f32 0.5, %v266_v44  ;;  %v271_v49 = vmul.f32 0.5, %v267_v45 }
 0x3ab   :  { %427 = vtanh.f32 %v268_v46 }
 0x3ac   :  { %429 = vtanh.f32 %v269_v47 }
 0x3ad   :  { %431 = vtanh.f32 %v270_v48 }
 0x3ae   :  { %433 = vtanh.f32 %v271_v49 }
 0x3b8   :  { %v428_v51 = vpop.eup %427 }
 0x3b9   :  { %v430_v52 = vpop.eup %429  ;;  %v276_v53 = vmul.f32 0.5, %v428_v51 }
 0x3ba   :  { %v432_v54 = vpop.eup %431  ;;  %v277_v55 = vmul.f32 0.5, %v430_v52 }
 0x3bb   :  { %v434_v56 = vpop.eup %433  ;;  %v280_v57 = vadd.f32 0.5, %v276_v53  ;;  %v278_v59 = vmul.f32 0.5, %v432_v54 }
 0x3bc   :  { %v281_v60 = vadd.f32 0.5, %v277_v55  ;;  %v279_v61 = vmul.f32 0.5, %v434_v56 }
 0x3bd   :  { %v300_v62 = vmul.f32 %v286_v50, %v280_v57  ;;  %v282_v63 = vadd.f32 0.5, %v278_v59 }
 0x3be   :  { %v301_v4 = vmul.f32 %v290_v58, %v281_v60  ;;  %v283_v6 = vadd.f32 0.5, %v279_v61 }
 0x3bf   :  { %v302_v8 = vmul.f32 %v294_v0, %v282_v63 }
 0x3c0   :  { %v304_v7 = vadd.f32 %v301_v4, %v300_v62  ;;  %v303_v10 = vmul.f32 %v298_v9, %v283_v6 }
 0x3c2   :  { %v305_v11 = vadd.f32 %v304_v7, %v302_v8 }
 0x3c4   :  { %v306_v12 = vadd.f32 %v305_v11, %v303_v10 }
 0x3c6   :  { %v307_v13 = vrot.slane %v306_v12, 4 }
 0x3c8   :  { %v308_v14 = vadd.f32 %v307_v13, %v306_v12 }
 0x3ca   :  { %v309_v15 = vrot.slane %v308_v14, 2 }
 0x3cc   :  { %v310_v16 = vadd.f32 %v309_v15, %v308_v14 }
 0x3ce   :  { %v311_v17 = vrot.slane %v310_v16, 1 }
 0x3d0   :  { %v312_v19 = vadd.f32 %v311_v17, %v310_v16 }
 0x3d2   :  { %v318_v21 = vadd.f32 %v316_v18, %v312_v19 }
 0x3d4   :  { %v319_v22 = vmul.f32 %v507_v20, %v318_v21 }
 0x3d6   :  { %v320_v23 = vmul.f32 %v319_v22, %v319_v22 }
 0x3d8   :  { %v322_v24 = vsel %vm321_vm2, %v320_v23, 0.0 }
 0x3d9   :  { %323 = vadd.xlane.f32.xlu1 %v322_v24 }
 0x462   :  { %v324_v25 = vpop.xlane.xlu1 %323 }
 0x463   :  { %v325_v26 = vrot.slane %v324_v25, 4 }
 0x465   :  { %v326_v27 = vadd.f32 %v325_v26, %v324_v25 }
 0x467   :  { %v327_v28 = vrot.slane %v326_v27, 2 }
 0x469   :  { %v328_v29 = vadd.f32 %v327_v28, %v326_v27 }
 0x46b   :  { %v329_v30 = vrot.slane %v328_v29, 1 }
 0x46d   :  { %v330_v31 = vadd.f32 %v329_v30, %v328_v29 }
 0x46f   :  { %391 = vpush %v330_v31 }
 0x4a0   :  { %s392_s20 = spop %391 }
 0x4a1   :  { %v332_v32 = vstv %s392_s20 }
 0x4a2   :  { %435 = vrsqrt.f32 %v332_v32 }
 0x4af   :  { %v436_v33 = vpop.eup %435 }
 0x4b0   :  { %393 = vpush %v436_v33 }
 0x4e1   :  { %s394_s21 = spop %393 }
 0x4e2   :  { %v335_v34 = vstv %s394_s21 }
 0x4e3   :  { %v336_v20 = vmul.f32 %v335_v34, %v318_v21 }
 0x4e5   :  { %v337_v35 = vmul.f32 0.5, %v336_v20 }
 0x4e7   :  { %437 = vtanh.f32 %v337_v35 }
 0x4f4   :  { %v438_v36 = vpop.eup %437 }
 0x4f5   :  { %v339_v37 = vmul.f32 0.5, %v438_v36 }
 0x4f7   :  { %v340_v38 = vadd.f32 0.5, %v339_v37 }
 0x4f9   :  { %341 = vst [vmem:[%s539_s2] sm:$0x1] %v340_v38 }
 0x4fa   :  { %346 = vsyncpa [#allocation3], 1 }

</bundles_post_ra>
